<compile_context>
chip_gen: v5e
topology: v5e:2x2
jax: 0.10.0
libtpu: 0.0.40
codegen_flags: <defaults>
</compile_context>

<pallas_src>
import jax
import jax.numpy as jnp
from jax.experimental import pallas as pl
from jax.experimental.pallas import tpu as pltpu

# ---------------- problem sizes (small, consistent with the signature) -------
N_NODES = 16   # ligand atoms
POS_DIM = 3    # 3D coordinates
F_IN    = 16   # input node-feature (ligand_v) dim
HIDDEN  = 32   # hidden dim
N_EDGES = 32   # number of edges
F_EDGE  = 4    # edge_attr dim

OUT_LANES = 128                      # lane-dense output slab width

# ---- dynamic (per-call) slab layout: f32 (_DYN_ROWS, DYN_LANES) -------------
DYN_LANES = 8 + 2 * N_NODES          # 40 : [edge consts(8) | src 1-hot | dst 1-hot]
_DR_NODE  = 0                        # rows 0..N-1        : [v | pos | 1 | 0...]
_DR_DST   = N_NODES                  # row N              : dst indices (f32) lanes 0..E-1
_DR_EDGE  = N_NODES + 8              # rows N+8..N+8+E-1  : per-edge row
_DYN_ROWS = N_NODES + 8 + N_EDGES    # 56

# node-row lane layout
_NL_POS = F_IN                       # pos at lanes 16..18
_NL_ONE = F_IN + POS_DIM             # constant 1.0 lane (picks up b_in)

# edge-row lane layout (lanes 0..7), followed by one-hot lanes
_EL_ATTR   = 0                       # eattr lanes 0..3
_EL_ONE    = F_EDGE                  # 4 : constant 1.0 lane (picks up b_m)
_EL_SRC    = 6                       # src index (f32)
_EL_DST    = 7                       # dst index (f32)
_EL_OH_SRC = 8                       # src one-hot lanes 8..8+N-1
_EL_OH_DST = 8 + N_NODES             # dst one-hot lanes 24..39

# ---- static weight slab layout: f32 (_W_ROWS, 128) --------------------------
_WR_SD3_C0 = HIDDEN                  # rows 0..31, lanes 32..127: [wm_src|wm_dst|wu_h]
_WR_EDGE   = DYN_LANES               # rows 40..47: wm_e (4 rows), b_m (row 44), 0
_WR_WUAGG  = _WR_EDGE + 8            # rows 48..79: wu_agg
_WR_WMD    = _WR_WUAGG + HIDDEN      # 80
_WR_WPOS   = _WR_WMD + 1             # 81
_WR_BU     = _WR_WPOS + 1            # 82
_W_ROWS    = 88

assert _DYN_ROWS % 8 == 0 and _W_ROWS % 8 == 0
assert N_EDGES <= DYN_LANES and _EL_OH_DST + N_NODES == DYN_LANES
assert 4 * HIDDEN == OUT_LANES and _NL_ONE + 1 <= DYN_LANES


# ---------------- Pallas kernel ----------------------------------------------
def _egnn_kernel(dyn_ref, w_ref, t_ref, out_ref):
    f32 = jnp.float32
    N, E, D, P = N_NODES, N_EDGES, HIDDEN, POS_DIM
    t = t_ref[0, 0]                                            # scalar (SMEM)

    node  = dyn_ref[_DR_NODE:_DR_NODE + N, :]                  # (N, 40) [v|pos|1|0]
    pos   = node[:, _NL_POS:_NL_POS + P]                       # (N, 3)
    dst_r = dyn_ref[_DR_DST:_DR_DST + 1, 0:E]                  # (1, E)  dst (f32)
    edge  = dyn_ref[_DR_EDGE:_DR_EDGE + E, :]                  # (E, 40) [ea|1|0|s|d|0..]

    # 1) node embedding (b_in folded in via the constant-1 node lane)
    h = jnp.maximum(
        jnp.dot(node, w_ref[0:DYN_LANES, 0:D], preferred_element_type=f32) + t,
        0.0)                                                   # (N, D)

    # 2) hoisted node-side projections: [h@wm_src | h@wm_dst | h@wu_h]
    hW = jnp.dot(h, w_ref[0:D, _WR_SD3_C0:_WR_SD3_C0 + 3 * D],
                 preferred_element_type=f32)                   # (N, 3D)

    # 3) fused lane-aligned gather: one (E,40)@(40,D+3) matmul
    lane  = jax.lax.broadcasted_iota(jnp.int32, (E, DYN_LANES), 1)
    src_i = edge[:, _EL_SRC:_EL_SRC + 1].astype(jnp.int32)     # (E, 1)
    dst_i = edge[:, _EL_DST:_EL_DST + 1].astype(jnp.int32)     # (E, 1)
    onehot = ((lane == src_i + _EL_OH_SRC) |
              (lane == dst_i + _EL_OH_DST)).astype(f32)        # (E, 40)
    # edge lanes 5..7 carry zeros / raw indices; they meet zero rhs rows below.
    G = edge + onehot                                          # (E, 40)

    R = jnp.concatenate([
        w_ref[_WR_EDGE:_WR_EDGE + 8, 0:D + P],                 # [wm_e; b_m; 0 | 0pos]
        jnp.concatenate([hW[:, 0:D],     pos], axis=1),        # src rows: [h@Ws | +pos]
        jnp.concatenate([hW[:, D:2 * D], -pos], axis=1),       # dst rows: [h@Wd | -pos]
    ], axis=0)                                                 # (40, D+3)
    gathered = jnp.dot(G, R, preferred_element_type=f32)       # (E, D+3)

    rel   = gathered[:, D:D + P]                               # pos_src - pos_dst
    dist2 = jnp.sum(rel * rel, axis=-1, keepdims=True)         # (E, 1)

    # 4) edge message (eattr@wm_e and b_m already folded into `gathered`)
    m = jnp.maximum(
        gathered[:, 0:D] + dist2 * w_ref[_WR_WMD:_WR_WMD + 1, 0:D], 0.0)   # (E, D)

    # coordinate-update coefficient: lane reduction (VPU/XLU; MXU stays free)
    coef = jnp.sum(m * w_ref[_WR_WPOS:_WR_WPOS + 1, 0:D], axis=-1, keepdims=True)

    # 5) fused scatter-add into a 128-lane slab: [agg | pos_delta | 0...]
    rows = jax.lax.broadcasted_iota(jnp.int32, (N, E), 0)
    smat = (rows == dst_r.astype(jnp.int32)).astype(f32)       # (N, E)
    payload = jnp.concatenate(
        [m, rel * coef, jnp.zeros((E, OUT_LANES - D - P), f32)], axis=1)   # (E, 128)
    scat = jnp.dot(smat, payload, preferred_element_type=f32)  # (N, 128)

    # 6) node / coordinate update -> single unmasked lane-dense store
    upd = jnp.maximum(
        hW[:, 2 * D:3 * D]
        + jnp.dot(scat[:, 0:D], w_ref[_WR_WUAGG:_WR_WUAGG + D, 0:D],
                  preferred_element_type=f32)
        + w_ref[_WR_BU:_WR_BU + 1, 0:D],
        0.0)                                                   # (N, D)
    out_ref[...] = jnp.concatenate(
        [h + upd,                                              # lanes 0..D-1
         pos + scat[:, D:D + P],                               # lanes D..D+2
         scat[:, D + P:]],                                     # already-zero lanes
        axis=1)


# ---------------- parameter init + host-side packing (done once) -------------
def pack_params(p):
    W = jnp.zeros((_W_ROWS, OUT_LANES), jnp.float32)
    W = W.at[0:F_IN, 0:HIDDEN].set(p["w_in"])
    W = W.at[_NL_ONE, 0:HIDDEN].set(p["b_in"][0])
    W = W.at[0:HIDDEN, _WR_SD3_C0:_WR_SD3_C0 + HIDDEN].set(p["wm_src"])
    W = W.at[0:HIDDEN, _WR_SD3_C0 + HIDDEN:_WR_SD3_C0 + 2 * HIDDEN].set(p["wm_dst"])
    W = W.at[0:HIDDEN, _WR_SD3_C0 + 2 * HIDDEN:_WR_SD3_C0 + 3 * HIDDEN].set(p["wu_h"])
    W = W.at[_WR_EDGE + _EL_ATTR:_WR_EDGE + _EL_ATTR + F_EDGE, 0:HIDDEN].set(p["wm_e"])
    W = W.at[_WR_EDGE + _EL_ONE, 0:HIDDEN].set(p["b_m"][0])
    W = W.at[_WR_WUAGG:_WR_WUAGG + HIDDEN, 0:HIDDEN].set(p["wu_agg"])
    W = W.at[_WR_WMD, 0:HIDDEN].set(p["wm_d"][0])
    W = W.at[_WR_WPOS, 0:HIDDEN].set(p["w_pos"][:, 0])
    W = W.at[_WR_BU, 0:HIDDEN].set(p["b_u"][0])
    return W


def init_params(key, f_in=F_IN, hidden=HIDDEN, f_edge=F_EDGE):
    ks = jax.random.split(key, 8)
    s = 0.1
    p = {
        "w_in":   s * jax.random.normal(ks[0], (f_in, hidden), jnp.float32),
        "b_in":   jnp.zeros((1, hidden), jnp.float32),
        "wm_src": s * jax.random.normal(ks[1], (hidden, hidden), jnp.float32),
        "wm_dst": s * jax.random.normal(ks[2], (hidden, hidden), jnp.float32),
        "wm_d":   s * jax.random.normal(ks[3], (1, hidden), jnp.float32),
        "wm_e":   s * jax.random.normal(ks[4], (f_edge, hidden), jnp.float32),
        "b_m":    jnp.zeros((1, hidden), jnp.float32),
        "wu_h":   s * jax.random.normal(ks[5], (hidden, hidden), jnp.float32),
        "wu_agg": s * jax.random.normal(ks[6], (hidden, hidden), jnp.float32),
        "b_u":    jnp.zeros((1, hidden), jnp.float32),
        "w_pos":  s * jax.random.normal(ks[7], (hidden, 1), jnp.float32),
    }
    p["w_slab"] = pack_params(p)          # packed once, reused every call
    return p


# ---------------- pure-JAX reference (same synthesized math) ------------------
def _reference_forward(params, ligand_pos, ligand_v, edge_index, t, edge_attr):
    hp = jax.lax.Precision.HIGHEST
    pos = ligand_pos.astype(jnp.float32)
    v = ligand_v.astype(jnp.float32)
    src, dst = edge_index[0], edge_index[1]
    h = jax.nn.relu(jnp.dot(v, params["w_in"], precision=hp) + params["b_in"] + t)
    h_src, h_dst = h[src], h[dst]
    p_src, p_dst = pos[src], pos[dst]
    rel = p_src - p_dst
    dist2 = jnp.sum(rel * rel, axis=-1, keepdims=True)
    m = jax.nn.relu(jnp.dot(h_src, params["wm_src"], precision=hp)
                    + jnp.dot(h_dst, params["wm_dst"], precision=hp)
                    + dist2 * params["wm_d"]
                    + jnp.dot(edge_attr.astype(jnp.float32), params["wm_e"], precision=hp)
                    + params["b_m"])
    agg = jnp.zeros((pos.shape[0], m.shape[1]), jnp.float32).at[dst].add(m)
    h_new = h + jax.nn.relu(jnp.dot(h, params["wu_h"], precision=hp)
                            + jnp.dot(agg, params["wu_agg"], precision=hp)
                            + params["b_u"])
    coef = jnp.dot(m, params["w_pos"], precision=hp)
    pos_new = pos + jnp.zeros_like(pos).at[dst].add(rel * coef)
    return pos_new, h_new


# ---------------- wrapper (mirrors SynthModel.forward signature) -------------
def synth_model_forward(params, ligand_pos, ligand_v, edge_index, t,
                        edge_attr=None, batch=None):
    f32 = jnp.float32
    ei = edge_index.astype(jnp.int32)                      # (2, E), PyTorch layout
    N, P = ligand_pos.shape
    E = ei.shape[1]
    assert N == N_NODES and E == N_EDGES and P == POS_DIM
    assert ligand_v.shape == (N, F_IN)
    if edge_attr is None:
        edge_attr = jnp.zeros((E, F_EDGE), f32)
    assert edge_attr.shape == (E, F_EDGE)

    # single per-call dynamic slab: node feats+pos+1, dst row, per-edge row
    node_block = jnp.concatenate(
        [ligand_v.astype(f32), ligand_pos.astype(f32), jnp.ones((N, 1), f32),
         jnp.zeros((N, DYN_LANES - _NL_ONE - 1), f32)], axis=1)             # (N, 40)
    dst_block = jnp.pad(ei[1].astype(f32).reshape(1, E),
                        ((0, 7), (0, DYN_LANES - E)))                       # (8, 40)
    edge_block = jnp.concatenate(
        [edge_attr.astype(f32),                     # lanes 0..3
         jnp.ones((E, 1), f32),                     # lane 4 (picks up b_m)
         jnp.zeros((E, 1), f32),                    # lane 5
         ei[0].astype(f32).reshape(E, 1),           # lane 6: src
         ei[1].astype(f32).reshape(E, 1),           # lane 7: dst
         jnp.zeros((E, DYN_LANES - _EL_OH_SRC), f32)], axis=1)              # (E, 40)
    dyn = jnp.concatenate([node_block, dst_block, edge_block], axis=0)      # (56, 40)

    t_arr = jnp.asarray(t, f32).reshape(1, 1)               # SMEM scalar

    vmem = pl.BlockSpec(memory_space=pltpu.MemorySpace.VMEM)
    smem = pl.BlockSpec(memory_space=pltpu.MemorySpace.SMEM)

    slab = pl.pallas_call(
        _egnn_kernel,
        out_shape=jax.ShapeDtypeStruct((N_NODES, OUT_LANES), jnp.float32),
        in_specs=[vmem, vmem, smem],
        out_specs=vmem,
    )(dyn, params["w_slab"], t_arr)

    h_out   = slab[:, :HIDDEN]
    pos_out = slab[:, HIDDEN:HIDDEN + POS_DIM]
    return pos_out, h_out


# ---------------- main --------------------------------------------------------
if __name__ == "__main__":
    key = jax.random.PRNGKey(0)
    k_pos, k_v, k_ei, k_ea, k_par = jax.random.split(key, 5)

    ligand_pos = jax.random.normal(k_pos, (N_NODES, POS_DIM), jnp.float32)
    ligand_v   = jax.random.normal(k_v,   (N_NODES, F_IN),    jnp.float32)
    edge_index = jax.random.randint(k_ei, (2, N_EDGES), 0, N_NODES, jnp.int32)
    edge_attr  = jax.random.normal(k_ea,  (N_EDGES, F_EDGE),  jnp.float32)
    t          = jnp.float32(0.5)
    batch      = jnp.zeros((N_NODES,), jnp.int32)

    params = init_params(k_par)

    pos_out, h_out = synth_model_forward(
        params, ligand_pos, ligand_v, edge_index, t, edge_attr, batch)
    jax.block_until_ready((pos_out, h_out))

    # pure-JAX reference check of the synthesized math
    pos_ref, h_ref = _reference_forward(
        params, ligand_pos, ligand_v, edge_index, t, edge_attr)

    assert pos_out.shape == (N_NODES, POS_DIM)
    assert h_out.shape == (N_NODES, HIDDEN)
    assert bool(jnp.all(jnp.isfinite(pos_out))) and bool(jnp.all(jnp.isfinite(h_out)))
    assert bool(jnp.allclose(pos_out, pos_ref, rtol=1e-3, atol=1e-3))
    assert bool(jnp.allclose(h_out, h_ref, rtol=1e-3, atol=1e-3))
    print("KERNEL_OK")
</pallas_src>

<mosaic_0001>
module attributes {stable_mosaic.version = 11 : i64} {
  func.func @_egnn_kernel(%arg0: memref<56x40xf32, #tpu.memory_space<vmem>>, %arg1: memref<88x128xf32, #tpu.memory_space<vmem>>, %arg2: memref<1x1xf32, #tpu.memory_space<smem>>, %arg3: memref<16x128xf32, #tpu.memory_space<vmem>>) attributes {dimension_semantics = [], scalar_prefetch = 0 : i64, scratch_operands = 0 : i64, tpu.core_type = #tpu.core_type<tc>} {
    %c0 = arith.constant 0 : index
    %c0_0 = arith.constant 0 : index
    %0 = memref.load %arg2[%c0, %c0_0] : memref<1x1xf32, #tpu.memory_space<smem>>
    %c0_1 = arith.constant 0 : index
    %c0_2 = arith.constant 0 : index
    %1 = vector.load %arg0[%c0_1, %c0_2] : memref<56x40xf32, #tpu.memory_space<vmem>>, vector<16x40xf32>
    %2 = vector.extract_strided_slice %1 {offsets = [0, 16], sizes = [16, 3], strides = [1, 1]} : vector<16x40xf32> to vector<16x3xf32>
    %c16 = arith.constant 16 : index
    %c0_3 = arith.constant 0 : index
    %3 = vector.load %arg0[%c16, %c0_3] : memref<56x40xf32, #tpu.memory_space<vmem>>, vector<1x32xf32>
    %c24 = arith.constant 24 : index
    %c0_4 = arith.constant 0 : index
    %4 = vector.load %arg0[%c24, %c0_4] : memref<56x40xf32, #tpu.memory_space<vmem>>, vector<32x40xf32>
    %c0_5 = arith.constant 0 : index
    %c0_6 = arith.constant 0 : index
    %5 = vector.load %arg1[%c0_5, %c0_6] : memref<88x128xf32, #tpu.memory_space<vmem>>, vector<40x32xf32>
    %cst = arith.constant dense<0.000000e+00> : vector<16x32xf32>
    %6 = tpu.matmul %1, %5, %cst {dimension_numbers = #tpu.dot_dimension_numbers<[1], [0], [0], [1], [0, 0, 1, 1], [], []>} : vector<16x40xf32>, vector<40x32xf32>, vector<16x32xf32> -> vector<16x32xf32>
    %7 = vector.broadcast %0 : f32 to vector<16x32xf32>
    %8 = arith.addf %6, %7 : vector<16x32xf32>
    %cst_7 = arith.constant 0.000000e+00 : f32
    %9 = vector.broadcast %cst_7 : f32 to vector<16x32xf32>
    %10 = arith.maximumf %8, %9 : vector<16x32xf32>
    %c0_8 = arith.constant 0 : index
    %c32 = arith.constant 32 : index
    %11 = vector.load %arg1[%c0_8, %c32] : memref<88x128xf32, #tpu.memory_space<vmem>>, vector<32x96xf32>
    %cst_9 = arith.constant dense<0.000000e+00> : vector<16x96xf32>
    %12 = tpu.matmul %10, %11, %cst_9 {dimension_numbers = #tpu.dot_dimension_numbers<[1], [0], [0], [1], [0, 0, 1, 1], [], []>} : vector<16x32xf32>, vector<32x96xf32>, vector<16x96xf32> -> vector<16x96xf32>
    %13 = tpu.iota {dimensions = array<i32: 1>} : vector<32x40xi32>
    %14 = vector.extract_strided_slice %4 {offsets = [0, 6], sizes = [32, 1], strides = [1, 1]} : vector<32x40xf32> to vector<32x1xf32>
    %15 = arith.fptosi %14 : vector<32x1xf32> to vector<32x1xi32>
    %16 = vector.extract_strided_slice %4 {offsets = [0, 7], sizes = [32, 1], strides = [1, 1]} : vector<32x40xf32> to vector<32x1xf32>
    %17 = arith.fptosi %16 : vector<32x1xf32> to vector<32x1xi32>
    %c8_i32 = arith.constant 8 : i32
    %18 = vector.broadcast %c8_i32 : i32 to vector<32x1xi32>
    %19 = arith.addi %15, %18 : vector<32x1xi32>
    %20 = vector.broadcast %19 : vector<32x1xi32> to vector<32x40xi32>
    %21 = arith.cmpi eq, %13, %20 : vector<32x40xi32>
    %c24_i32 = arith.constant 24 : i32
    %22 = vector.broadcast %c24_i32 : i32 to vector<32x1xi32>
    %23 = arith.addi %17, %22 : vector<32x1xi32>
    %24 = vector.broadcast %23 : vector<32x1xi32> to vector<32x40xi32>
    %25 = arith.cmpi eq, %13, %24 : vector<32x40xi32>
    %26 = arith.ori %21, %25 : vector<32x40xi1>
    %27 = arith.extui %26 : vector<32x40xi1> to vector<32x40xi32>
    %28 = arith.sitofp %27 : vector<32x40xi32> to vector<32x40xf32>
    %29 = arith.addf %4, %28 : vector<32x40xf32>
    %c40 = arith.constant 40 : index
    %c0_10 = arith.constant 0 : index
    %30 = vector.load %arg1[%c40, %c0_10] : memref<88x128xf32, #tpu.memory_space<vmem>>, vector<8x35xf32>
    %31 = vector.extract_strided_slice %12 {offsets = [0, 0], sizes = [16, 32], strides = [1, 1]} : vector<16x96xf32> to vector<16x32xf32>
    %32 = tpu.concatenate %31, %2 in 1 : vector<16x32xf32>, vector<16x3xf32> -> vector<16x35xf32>
    %33 = vector.extract_strided_slice %12 {offsets = [0, 32], sizes = [16, 32], strides = [1, 1]} : vector<16x96xf32> to vector<16x32xf32>
    %cst_11 = arith.constant 0.000000e+00 : f32
    %34 = vector.broadcast %cst_11 : f32 to vector<16x3xf32>
    %35 = arith.subf %34, %2 : vector<16x3xf32>
    %36 = tpu.concatenate %33, %35 in 1 : vector<16x32xf32>, vector<16x3xf32> -> vector<16x35xf32>
    %37 = tpu.concatenate %30, %32, %36 in 0 : vector<8x35xf32>, vector<16x35xf32>, vector<16x35xf32> -> vector<40x35xf32>
    %cst_12 = arith.constant dense<0.000000e+00> : vector<32x35xf32>
    %38 = tpu.matmul %29, %37, %cst_12 {dimension_numbers = #tpu.dot_dimension_numbers<[1], [0], [0], [1], [0, 0, 1, 1], [], []>} : vector<32x40xf32>, vector<40x35xf32>, vector<32x35xf32> -> vector<32x35xf32>
    %39 = vector.extract_strided_slice %38 {offsets = [0, 32], sizes = [32, 3], strides = [1, 1]} : vector<32x35xf32> to vector<32x3xf32>
    %40 = arith.mulf %39, %39 : vector<32x3xf32>
    %cst_13 = arith.constant dense<0.000000e+00> : vector<32xf32>
    %41 = vector.multi_reduction <add>, %40, %cst_13 [1] : vector<32x3xf32> to vector<32xf32>
    %42 = vector.shape_cast %41 : vector<32xf32> to vector<32x1xf32>
    %43 = vector.extract_strided_slice %38 {offsets = [0, 0], sizes = [32, 32], strides = [1, 1]} : vector<32x35xf32> to vector<32x32xf32>
    %c80 = arith.constant 80 : index
    %c0_14 = arith.constant 0 : index
    %44 = vector.load %arg1[%c80, %c0_14] : memref<88x128xf32, #tpu.memory_space<vmem>>, vector<1x32xf32>
    %45 = vector.broadcast %42 : vector<32x1xf32> to vector<32x32xf32>
    %46 = vector.broadcast %44 : vector<1x32xf32> to vector<32x32xf32>
    %47 = arith.mulf %45, %46 : vector<32x32xf32>
    %48 = arith.addf %43, %47 : vector<32x32xf32>
    %cst_15 = arith.constant 0.000000e+00 : f32
    %49 = vector.broadcast %cst_15 : f32 to vector<32x32xf32>
    %50 = arith.maximumf %48, %49 : vector<32x32xf32>
    %c81 = arith.constant 81 : index
    %c0_16 = arith.constant 0 : index
    %51 = vector.load %arg1[%c81, %c0_16] : memref<88x128xf32, #tpu.memory_space<vmem>>, vector<1x32xf32>
    %52 = vector.broadcast %51 : vector<1x32xf32> to vector<32x32xf32>
    %53 = arith.mulf %50, %52 : vector<32x32xf32>
    %cst_17 = arith.constant dense<0.000000e+00> : vector<32xf32>
    %54 = vector.multi_reduction <add>, %53, %cst_17 [1] : vector<32x32xf32> to vector<32xf32>
    %55 = vector.shape_cast %54 : vector<32xf32> to vector<32x1xf32>
    %56 = tpu.iota {dimensions = array<i32: 0>} : vector<16x32xi32>
    %57 = arith.fptosi %3 : vector<1x32xf32> to vector<1x32xi32>
    %58 = vector.broadcast %57 : vector<1x32xi32> to vector<16x32xi32>
    %59 = arith.cmpi eq, %56, %58 : vector<16x32xi32>
    %60 = arith.extui %59 : vector<16x32xi1> to vector<16x32xi32>
    %61 = arith.sitofp %60 : vector<16x32xi32> to vector<16x32xf32>
    %62 = vector.broadcast %55 : vector<32x1xf32> to vector<32x3xf32>
    %63 = arith.mulf %39, %62 : vector<32x3xf32>
    %cst_18 = arith.constant 0.000000e+00 : f32
    %64 = vector.broadcast %cst_18 : f32 to vector<32x93xf32>
    %65 = tpu.concatenate %50, %63, %64 in 1 : vector<32x32xf32>, vector<32x3xf32>, vector<32x93xf32> -> vector<32x128xf32>
    %cst_19 = arith.constant dense<0.000000e+00> : vector<16x128xf32>
    %66 = tpu.matmul %61, %65, %cst_19 {dimension_numbers = #tpu.dot_dimension_numbers<[1], [0], [0], [1], [0, 0, 1, 1], [], []>} : vector<16x32xf32>, vector<32x128xf32>, vector<16x128xf32> -> vector<16x128xf32>
    %67 = vector.extract_strided_slice %12 {offsets = [0, 64], sizes = [16, 32], strides = [1, 1]} : vector<16x96xf32> to vector<16x32xf32>
    %68 = vector.extract_strided_slice %66 {offsets = [0, 0], sizes = [16, 32], strides = [1, 1]} : vector<16x128xf32> to vector<16x32xf32>
    %c48 = arith.constant 48 : index
    %c0_20 = arith.constant 0 : index
    %69 = vector.load %arg1[%c48, %c0_20] : memref<88x128xf32, #tpu.memory_space<vmem>>, vector<32x32xf32>
    %cst_21 = arith.constant dense<0.000000e+00> : vector<16x32xf32>
    %70 = tpu.matmul %68, %69, %cst_21 {dimension_numbers = #tpu.dot_dimension_numbers<[1], [0], [0], [1], [0, 0, 1, 1], [], []>} : vector<16x32xf32>, vector<32x32xf32>, vector<16x32xf32> -> vector<16x32xf32>
    %71 = arith.addf %67, %70 : vector<16x32xf32>
    %c82 = arith.constant 82 : index
    %c0_22 = arith.constant 0 : index
    %72 = vector.load %arg1[%c82, %c0_22] : memref<88x128xf32, #tpu.memory_space<vmem>>, vector<1x32xf32>
    %73 = vector.broadcast %72 : vector<1x32xf32> to vector<16x32xf32>
    %74 = arith.addf %71, %73 : vector<16x32xf32>
    %cst_23 = arith.constant 0.000000e+00 : f32
    %75 = vector.broadcast %cst_23 : f32 to vector<16x32xf32>
    %76 = arith.maximumf %74, %75 : vector<16x32xf32>
    %77 = arith.addf %10, %76 : vector<16x32xf32>
    %78 = vector.extract_strided_slice %66 {offsets = [0, 32], sizes = [16, 3], strides = [1, 1]} : vector<16x128xf32> to vector<16x3xf32>
    %79 = arith.addf %2, %78 : vector<16x3xf32>
    %80 = vector.extract_strided_slice %66 {offsets = [0, 35], sizes = [16, 93], strides = [1, 1]} : vector<16x128xf32> to vector<16x93xf32>
    %81 = tpu.concatenate %77, %79, %80 in 1 : vector<16x32xf32>, vector<16x3xf32>, vector<16x93xf32> -> vector<16x128xf32>
    %c0_24 = arith.constant 0 : index
    %c0_25 = arith.constant 0 : index
    %82 = vector.load %arg3[%c0_24, %c0_25] : memref<16x128xf32, #tpu.memory_space<vmem>>, vector<16x128xf32>
    tpu.vector_store %arg3[%c0_24, %c0_25], %81 {strides = array<i32>} : memref<16x128xf32, #tpu.memory_space<vmem>>, vector<16x128xf32>,
    return
  }
}

</mosaic_0001>

<bundles_post_ra>
// kernel: tpu_custom_call.1
= control target key start
LH: loop header
LB: loop body
LE: loop exit
PB: predicated region body
PF: predicated region fallthrough
CT: control target
= control target key end

     0   :  { %s592_s18 = smov 96   ;;  %s817_s0 = inlined_call_operand.vmem [shape: f32[56,40], index: 0, kind: input, shape index: {}]   ;;  %s818_s1 = inlined_call_operand.vmem [shape: f32[88,128], index: 1, kind: input, shape index: {}]   ;;  %s819_s2 = inlined_call_operand.<no memory space> [shape: f32[1,1], index: 2, kind: input, shape index: {}]   ;;  %s820_s3 = inlined_call_operand.hbm [shape: f32[16,128], index: 3, kind: output, shape index: {}]  }
   0x1   :  { %v28_v0 = vld [vmem:[%s818_s1 + $0x20] sm:$0xff]  ;;  %v27_v1 = vld [vmem:[%s818_s1 + $0x18] sm:$0xff]  ;;  %v26_v2 = vld [vmem:[%s818_s1 + $0x10] sm:$0xff] }
   0x2   :  { %48 = vmatpush.msra.mxu0 %v28_v0  ;;  %v531_v3 = vpack.i.bf16 %v26_v2, %v27_v1 }
   0x4   :  { %49 = vmatpush.msra.mxu0 %v27_v1  ;;  %532 = vrot.lane.b32.xlu0 %v531_v3, %s592_s18 }
   0x5   :  { %9 = vsyncpa [#allocation4], 0  ;;  %v25_v4 = vld [vmem:[%s818_s1 + $0x8] sm:$0xff]  ;;  %v24_v5 = vld [vmem:[%s818_s1] sm:$0xff]  ;;  %vm30_vm0 = vcmask 326656   ;;  %s593_s27 = smov 16   ;;  %v29_v16 = vstv %s819_s2  ;;  %v112_v61 = vlaneseq }
   0x6   :  { %50 = vmatpush.msra.mxu0 %v26_v2  ;;  %v641_v6 = vld [vmem:[%s817_s0] sm:$0xff]  ;;  %v536_v7 = vpack.i.bf16 %v24_v5, %v25_v4  ;;  %v649_v8 = vld [vmem:[%s817_s0 + $0x8] sm:$0xff]  ;;  %vm82_vm1 = vcmask 261120   ;;  %v677_v26 = vld [vmem:[%s817_s0 + $0x18] sm:$0xff]  ;;  %v594_v28 = vmov 7   ;;  %v595_v29 = vmov 6  }
   0x7   :  { %v546_v9 = vpack.i.bf16 %v641_v6, %v649_v8  ;;  %v183_v23 = vsub.f32 0.0, %v641_v6  ;;  %v184_v24 = vsub.f32 0.0, %v649_v8  ;;  %vm496_vm2 = vcmp.lt.s32.totalorder %v677_v26, 0  ;;  %552 = vset.pattern.permute.xlu0 %v594_v28  ;;  %558 = vset.pattern.permute.xlu1 %v595_v29  ;;  %v685_v34 = vld [vmem:[%s817_s0 + $0x20] sm:$0xff]  ;;  %v693_v38 = vld [vmem:[%s817_s0 + $0x28] sm:$0xff]  ;;  %v700_v41 = vld [vmem:[%s817_s0 + $0x30] sm:$0xff] }
   0x8   :  { %51 = vmatpush.msra.mxu0 %v25_v4  ;;  %v497_v27 = vceil.f32 %v677_v26  ;;  %v498_v30 = vfloor.f32 %v677_v26  ;;  %551 = vset.pattern.permute.xlu2 %v595_v29  ;;  %v502_v35 = vceil.f32 %v685_v34  ;;  %v503_v36 = vfloor.f32 %v685_v34  ;;  %s597_s28 = smov 64   ;;  %s598_s29 = smov 112  }
   0x9   :  { %547 = vrot.lane.b32.xlu2 %v546_v9, %s593_s27  ;;  %v541_v25 = vpack.i.bf16 %v183_v23, %v184_v24  ;;  %vm501_vm3 = vcmp.lt.s32.totalorder %v685_v34, 0  ;;  %v507_v39 = vceil.f32 %v693_v38  ;;  %v508_v40 = vfloor.f32 %v693_v38  ;;  %v174_v23 = vld [vmem:[%s818_s1 + $0x28] sm:$0xff]  ;;  %s453_s5 = sshll.u32 %s820_s3, 4  ;;  %s601_s6 = smov 8   ;;  %s454_s5 = int_to_ptr.hbm [resolvable:$true] %s453_s5 }
   0xa   :  { %52 = vmatpush.msra.mxu0 %v24_v5  ;;  %v499_v31 = vsel %vm496_vm2, %v497_v27, %v498_v30  ;;  %vm506_vm4 = vcmp.lt.s32.totalorder %v693_v38, 0  ;;  %v504_v42 = vsel %vm501_vm3, %v502_v35, %v503_v36  ;;  %v512_v45 = vceil.f32 %v700_v41 }
   0xb   :  { %465 = vmatmul.msk.f32.vlgmr.msra.gmra.mxu0 %vm30_vm0, %v641_v6  ;;  %542 = vrot.lane.b32.xlu1 %v541_v25, %s593_s27  ;;  %v500_v32 = vcvt.f32.s32 %v499_v31  ;;  %v509_v43 = vsel %vm506_vm4, %v507_v39, %v508_v40  ;;  %v513_v46 = vfloor.f32 %v700_v41  ;;  %v505_v47 = vcvt.f32.s32 %v504_v42 }
   0xc   :  { %537 = vrot.lane.b32.xlu0 %v536_v7, %s592_s18  ;;  %v510_v44 = vcvt.f32.s32 %v509_v43  ;;  %vm511_vm5 = vcmp.lt.s32.totalorder %v700_v41, 0  ;;  %v113_v63 = vand.u32 127, %v112_v61  ;;  %vm328_vm4 = vcmask 285696  }
   0xd   :  { %v138_v33 = vadd.s32 24, %v500_v32  ;;  %v118_v37 = vadd.s32 8, %v500_v32  ;;  %v139_v49 = vadd.s32 24, %v505_v47  ;;  %v514_v50 = vsel %vm511_vm5, %v512_v45, %v513_v46 }
   0xe   :  { %v120_v48 = vadd.s32 8, %v510_v44  ;;  %v515_v53 = vcvt.f32.s32 %v514_v50  ;;  %v119_v56 = vadd.s32 8, %v505_v47  ;;  %v140_v58 = vadd.s32 24, %v510_v44  ;;  %v563_v50 = vld [vmem:[%s818_s1 + $0x50] ss:$0 sm:$0xff] }
  0x10   :  { %v141_v55 = vadd.s32 24, %v515_v53  ;;  %v121_v57 = vadd.s32 8, %v515_v53 }
  0x11   :  { %123 = vperm.xlu2 %551, %v118_v37  }
  0x13   :  { %466 = vmatmul.msk.f32.gmra.mxu0 %vm30_vm0, %v649_v8 }
  0x14   :  { %143 = vperm.xlu0 %552, %v138_v33  }
  0x19   :  { %559 = vset.pattern.permute.xlu2 %v594_v28 }
  0x1a   :  { %146 = vperm.xlu2 %559, %v139_v49  }
  0x1c   :  { %560 = vset.pattern.permute.xlu0 %v595_v29 }
  0x1d   :  { %129 = vperm.xlu0 %560, %v120_v48  }
  0x22   :  { %152 = vperm.xlu2 %559, %v141_v55  }
  0x25   :  { %562 = vset.pattern.permute.xlu0 %v594_v28 }
  0x63   :  { %v548_v59 = vpop.permute.xlu2 %547 }
  0x64   :  { %v549_v7 = vunpack.i.l.bf16 %v548_v59 }
  0x6b   :  { %v124_v62 = vpop.permute.xlu2 %123 }
  0x6c   :  { %vm134_vm6 = vcmp.eq.s32.totalorder %v113_v63, %v124_v62 }
  0x74   :  { %v147_v5 = vpop.permute.xlu2 %146 }
  0x75   :  { %vm155_vm9 = vcmp.eq.s32.totalorder %v113_v63, %v147_v5 }
  0x76   :  { %v533_v10 = vpop.permute.xlu0 %532 }
  0x77   :  { %v534_v11 = vunpack.i.l.bf16 %v533_v10  ;;  %v535_v12 = vunpack.i.h.bf16 %v533_v10 }
  0x79   :  { %101 = vmatpush.msrb.mxu0 %v534_v11  ;;  %487 = vmatpush.msra.mxu1 %v534_v11  ;;  %v550_v11 = vunpack.i.h.bf16 %v548_v59 }
  0x7b   :  { %102 = vmatpush.msrb.mxu0 %v535_v12  ;;  %488 = vmatpush.msra.mxu1 %v535_v12 }
  0x7c   :  { %v153_v24 = vpop.permute.xlu2 %152 }
  0x7d   :  { %v543_v60 = vpop.permute.xlu1 %542  ;;  %vm157_vm12 = vcmp.eq.s32.totalorder %v113_v63, %v153_v24 }
  0x7e   :  { %v538_v13 = vpop.permute.xlu0 %537  ;;  %v544_v2 = vunpack.i.l.bf16 %v543_v60  ;;  %v545_v9 = vunpack.i.h.bf16 %v543_v60 }
  0x7f   :  { %v539_v14 = vunpack.i.l.bf16 %v538_v13  ;;  %v540_v15 = vunpack.i.h.bf16 %v538_v13  ;;  %v596_v13 = vmov 0.0  }
  0x81   :  { %103 = vmatpush.msrb.mxu0 %v539_v14  ;;  %489 = vmatpush.msra.mxu1 %v539_v14 }
  0x83   :  { %104 = vmatpush.msrb.mxu0 %v540_v15  ;;  %490 = vmatpush.msra.mxu1 %v540_v15 }
  0x86   :  { %v144_v0 = vpop.permute.xlu0 %143 }
  0x87   :  { %vm154_vm7 = vcmp.eq.s32.totalorder %v113_v63, %v144_v0 }
  0x88   :  { %v54_v17 = vpop.f32.mrf.mxu0  ;;  %vm158_vm8 = vmor %vm134_vm6, %vm154_vm7 }
  0x89   :  { %v659_v18 = vadd.f32 %v54_v17, %v29_v16  ;;  %v469_v14 = vsel %vm158_vm8, 1.0, %v596_v13 }
  0x8a   :  { %v170_v17 = vadd.f32 %v469_v14, %v677_v26 }
  0x8b   :  { %v60_v19 = vmax.f32 %v659_v18, 0.0 }
  0x8d   :  { %467 = vmatmul.msk.f32.vlgmr.msrb.gmra.mxu0 %vm82_vm1, %v60_v19 }
  0x8f   :  { %v130_v30 = vpop.permute.xlu0 %129 }
  0x90   :  { %v57_v20 = vpop.f32.mrf.mxu0  ;;  %vm136_vm15 = vcmp.eq.s32.totalorder %v113_v63, %v130_v30 }
  0x91   :  { %v665_v21 = vadd.f32 %v57_v20, %v29_v16 }
  0x93   :  { %v61_v22 = vmax.f32 %v665_v21, 0.0 }
  0x95   :  { %468 = vmatmul.msk.f32.vlgmr.msra.gmra.mxu1 %vm82_vm1, %v61_v22 }
 0x10a   :  { %v706_v51 = vpop.f32.mrf.mxu0 }
 0x10b   :  { %v181_v20 = vsel %vm82_vm1, %v706_v51, %v550_v11 }
 0x112   :  { %v708_v52 = vpop.f32.mrf.mxu1 }
 0x113   :  { %v553_v54 = vpack.i.bf16 %v706_v51, %v708_v52  ;;  %v182_v15 = vsel %vm82_vm1, %v708_v52, %v549_v7 }
 0x115   :  { %554 = vrot.lane.b32.xlu1 %v553_v54, %s592_s18 }
 0x11d   :  { %126 = vperm.xlu1 %558, %v119_v56   ;;  %v564_v56 = vld [vmem:[%s818_s1 + $0x51] ss:$0 sm:$0xff] }
 0x125   :  { %132 = vperm.xlu1 %558, %v121_v57  }
 0x12d   :  { %561 = vset.pattern.permute.xlu1 %v594_v28 }
 0x12e   :  { %149 = vperm.xlu1 %561, %v140_v58  }
 0x187   :  { %v555_v1 = vpop.permute.xlu1 %554 }
 0x188   :  { %v557_v3 = vunpack.i.h.bf16 %v555_v1  ;;  %v556_v4 = vunpack.i.l.bf16 %v555_v1 }
 0x18a   :  { %v202_v10 = vsel %vm82_vm1, %v556_v4, %v544_v2  ;;  %v201_v12 = vsel %vm82_vm1, %v557_v3, %v545_v9 }
 0x18b   :  { %226 = vmatpush.msra.mxu2 %v202_v10  ;;  %491 = vmatpush.msra.mxu3 %v202_v10 }
 0x18d   :  { %227 = vmatpush.msra.mxu2 %v201_v12  ;;  %492 = vmatpush.msra.mxu3 %v201_v12 }
 0x18f   :  { %v127_v16 = vpop.permute.xlu1 %126  ;;  %228 = vmatpush.msra.mxu2 %v182_v15  ;;  %493 = vmatpush.msra.mxu3 %v182_v15 }
 0x190   :  { %vm135_vm10 = vcmp.eq.s32.totalorder %v113_v63, %v127_v16 }
 0x191   :  { %229 = vmatpush.msra.mxu2 %v181_v20  ;;  %494 = vmatpush.msra.mxu3 %v181_v20  ;;  %vm159_vm11 = vmor %vm135_vm10, %vm155_vm9 }
 0x192   :  { %v470_v25 = vsel %vm159_vm11, 1.0, %v596_v13 }
 0x193   :  { %230 = vmatpush.msra.mxu2 %v174_v23  ;;  %495 = vmatpush.msra.mxu3 %v174_v23  ;;  %v171_v27 = vadd.f32 %v470_v25, %v685_v34  ;;  %v19_v25 = vld [vmem:[%s817_s0 + $0x10] sm:$0x1] }
 0x194   :  { %473 = vmatmul.msk.f32.vlgmr.msra.gmra.mxu2 %vm30_vm0, %v170_v17  ;;  %v518_v30 = vfloor.f32 %v19_v25  ;;  %vm516_vm5 = vcmp.lt.s32.totalorder %v19_v25, 0 }
 0x197   :  { %v133_v26 = vpop.permute.xlu1 %132 }
 0x198   :  { %vm137_vm13 = vcmp.eq.s32.totalorder %v113_v63, %v133_v26  ;;  %v365_v26 = vld [vmem:[%s818_s1 + $0x48] sm:$0xff] }
 0x199   :  { %vm161_vm14 = vmor %vm137_vm13, %vm157_vm12  ;;  %384 = vmatpush.msrb.mxu1 %v365_v26 }
 0x19a   :  { %v472_v28 = vsel %vm161_vm14, 1.0, %v596_v13 }
 0x19b   :  { %v173_v29 = vadd.f32 %v472_v28, %v700_v41  ;;  %v363_v28 = vld [vmem:[%s818_s1 + $0x38] sm:$0xff] }
 0x19c   :  { %474 = vmatmul.msk.f32.gmra.mxu2 %vm30_vm0, %v171_v27  ;;  %v364_v27 = vld [vmem:[%s818_s1 + $0x40] sm:$0xff] }
 0x19d   :  { %476 = vmatmul.msk.f32.vlgmr.msra.gmra.mxu3 %vm30_vm0, %v173_v29  ;;  %v517_v29 = vceil.f32 %v19_v25  ;;  %385 = vmatpush.msrb.mxu1 %v364_v27 }
 0x19f   :  { %386 = vmatpush.msrb.mxu1 %v363_v28 }
 0x1a0   :  { %v150_v31 = vpop.permute.xlu1 %149 }
 0x1a1   :  { %vm156_vm2 = vcmp.eq.s32.totalorder %v113_v63, %v150_v31  ;;  %v519_v31 = vsel %vm516_vm5, %v517_v29, %v518_v30 }
 0x1a2   :  { %vm160_vm3 = vmor %vm136_vm15, %vm156_vm2 }
 0x1a3   :  { %v471_v32 = vsel %vm160_vm3, 1.0, %v596_v13 }
 0x1a4   :  { %v172_v33 = vadd.f32 %v471_v32, %v693_v38 }
 0x1a6   :  { %475 = vmatmul.msk.f32.gmra.mxu2 %vm30_vm0, %v172_v33  ;;  %vm264_vm0 = vcmask 23552   ;;  %v520_v33 = vcvt.f32.s32 %v519_v31 }
 0x217   :  { %v735_v34 = vpop.f32.mrf.mxu2 }
 0x218   :  { %v244_v35 = vmul.f32 %v735_v34, %v735_v34 }
 0x21a   :  { %252 = vrot.lane.b32.xlu0 %v244_v35, %s592_s18 }
 0x21f   :  { %v740_v37 = vpop.f32.mrf.mxu2 }
 0x220   :  { %v241_v36 = vpop.f32.mrf.mxu3  ;;  %v245_v40 = vmul.f32 %v740_v37, %v740_v37 }
 0x221   :  { %v247_v39 = vmul.f32 %v241_v36, %v241_v36 }
 0x223   :  { %258 = vrot.lane.b32.xlu2 %v247_v39, %s592_s18 }
 0x229   :  { %v745_v41 = vpop.f32.mrf.mxu2 }
 0x22a   :  { %v246_v38 = vmul.f32 %v745_v41, %v745_v41 }
 0x22b   :  { %254 = vrot.lane.b32.xlu2 %v245_v40, %s592_s18 }
 0x22c   :  { %256 = vrot.lane.b32.xlu1 %v246_v38, %s592_s18  ;;  %v310_v38 = vshrl.u32 %v112_v61, 7 }
 0x27d   :  { %v259_v42 = vpop.permute.xlu2 %258 }
 0x27e   :  { %v274_v43 = vsel %vm264_vm0, %v259_v42, 0.0  ;;  %v313_v42 = vperm.slane %v520_v33, 0 }
 0x27f   :  { %275 = vadd.xlane.f32.xlu1 %v274_v43 }
 0x280   :  { %vm314_vm6 = vcmp.eq.s32.totalorder %v310_v38, %v313_v42 }
 0x285   :  { %v255_v44 = vpop.permute.xlu2 %254 }
 0x286   :  { %v268_v45 = vsel %vm264_vm0, %v255_v44, 0.0 }
 0x287   :  { %269 = vadd.xlane.f32.xlu0 %v268_v45 }
 0x28c   :  { %v253_v48 = vpop.permute.xlu0 %252 }
 0x28d   :  { %v265_v49 = vsel %vm264_vm0, %v253_v48, 0.0 }
 0x29e   :  { %v257_v46 = vpop.permute.xlu1 %256 }
 0x29f   :  { %v271_v47 = vsel %vm264_vm0, %v257_v46, 0.0  ;;  %v477_v46 = vsel %vm314_vm6, 1.0, %v596_v13 }
 0x2a0   :  { %272 = vadd.xlane.f32.xlu2 %v271_v47  ;;  %v362_v47 = vld [vmem:[%s818_s1 + $0x30] sm:$0xff] }
 0x2a1   :  { %387 = vmatpush.msrb.mxu1 %v362_v47 }
 0x2a8   :  { %266 = vadd.xlane.f32.xlu2 %v265_v49 }
 0x2f2   :  { %v276_v53 = vpop.xlane.xlu1 %275 }
 0x2f3   :  { %v282_v54 = vmul.f32 %v563_v50, %v276_v53 }
 0x2f5   :  { %v286_v55 = vadd.f32 %v282_v54, %v241_v36 }
 0x2f7   :  { %v290_v57 = vmax.f32 %v286_v55, 0.0 }
 0x2f9   :  { %v296_v58 = vmul.f32 %v564_v56, %v290_v57 }
 0x2fa   :  { %v270_v59 = vpop.xlane.xlu0 %269 }
 0x2fb   :  { %v280_v60 = vmul.f32 %v563_v50, %v270_v59  ;;  %v306_v62 = vsel %vm82_vm1, %v296_v58, 0.0 }
 0x2fc   :  { %307 = vadd.xlane.f32.xlu1 %v306_v62 }
 0x2fd   :  { %v284_v63 = vadd.f32 %v280_v60, %v740_v37 }
 0x2ff   :  { %v288_v0 = vmax.f32 %v284_v63, 0.0 }
 0x301   :  { %v294_v1 = vmul.f32 %v564_v56, %v288_v0 }
 0x303   :  { %v300_v2 = vsel %vm82_vm1, %v294_v1, 0.0 }
 0x304   :  { %301 = vadd.xlane.f32.xlu0 %v300_v2 }
 0x313   :  { %v273_v3 = vpop.xlane.xlu2 %272 }
 0x314   :  { %v281_v4 = vmul.f32 %v563_v50, %v273_v3 }
 0x316   :  { %v285_v5 = vadd.f32 %v281_v4, %v745_v41 }
 0x318   :  { %v289_v7 = vmax.f32 %v285_v5, 0.0 }
 0x31a   :  { %v295_v9 = vmul.f32 %v564_v56, %v289_v7 }
 0x31b   :  { %v267_v10 = vpop.xlane.xlu2 %266 }
 0x31c   :  { %v279_v11 = vmul.f32 %v563_v50, %v267_v10  ;;  %v303_v12 = vsel %vm82_vm1, %v295_v9, 0.0 }
 0x31d   :  { %304 = vadd.xlane.f32.xlu2 %v303_v12 }
 0x31e   :  { %v283_v14 = vadd.f32 %v279_v11, %v735_v34 }
 0x320   :  { %v287_v15 = vmax.f32 %v283_v14, 0.0 }
 0x322   :  { %v293_v16 = vmul.f32 %v564_v56, %v287_v15 }
 0x324   :  { %v297_v17 = vsel %vm82_vm1, %v293_v16, 0.0 }
 0x325   :  { %298 = vadd.xlane.f32.xlu1 %v297_v17 }
 0x36f   :  { %v308_v20 = vpop.xlane.xlu1 %307 }
 0x370   :  { %v323_v23 = vmul.f32 %v308_v20, %v241_v36 }
 0x372   :  { %v327_v24 = vsel %vm82_vm1, %v290_v57, %v323_v23 }
 0x373   :  { %479 = vmatpush.msk.msrb.mxu3 %vm328_vm4, %v327_v24 }
 0x377   :  { %v302_v32 = vpop.xlane.xlu0 %301 }
 0x378   :  { %v321_v36 = vmul.f32 %v302_v32, %v740_v37 }
 0x37a   :  { %v325_v43 = vsel %vm82_vm1, %v288_v0, %v321_v36 }
 0x390   :  { %v305_v35 = vpop.xlane.xlu2 %304 }
 0x391   :  { %v322_v39 = vmul.f32 %v305_v35, %v745_v41  ;;  %v311_v41 = vadd.s32 8, %v310_v38 }
 0x393   :  { %v326_v40 = vsel %vm82_vm1, %v289_v7, %v322_v39  ;;  %vm315_vm7 = vcmp.eq.s32.totalorder %v311_v41, %v313_v42 }
 0x394   :  { %480 = vmatpush.msk.msrb.mxu3 %vm328_vm4, %v326_v40  ;;  %v478_v61 = vsel %vm315_vm7, 1.0, %v596_v13 }
 0x396   :  { %481 = vmatpush.msk.msrb.mxu3 %vm328_vm4, %v325_v43 }
 0x398   :  { %v299_v44 = vpop.xlane.xlu1 %298 }
 0x399   :  { %v320_v45 = vmul.f32 %v299_v44, %v735_v34  ;;  %v565_v34 = vld [vmem:[%s818_s1 + $0x52] ss:$0 sm:$0xff]  ;;  %s599_s1 = smov [#allocation3]  }
 0x39a   :  { %408 = vrot.lane.b32.xlu1 %v565_v34, %s597_s28  ;;  %s451_s2 = sshll.u32 %s599_s1, 4  ;;  %s452_s2 = int_to_ptr.vmem [resolvable:$true] %s451_s2 }
 0x39b   :  { %v324_v37 = vsel %vm82_vm1, %v287_v15, %v320_v45 }
 0x39c   :  { %482 = vmatpush.msk.msrb.mxu3 %vm328_vm4, %v324_v37 }
 0x39d   :  { %483 = vmatmul.msk.f32.vlgmr.msrb.gmra.mxu3 %vm82_vm1, %v477_v46 }
 0x3a5   :  { %484 = vmatmul.msk.f32.gmra.mxu3 %vm82_vm1, %v478_v61 }
 0x40c   :  { %v409_v54 = vpop.permute.xlu1 %408 }
 0x420   :  { %v356_v48 = vpop.f32.mrf.mxu3 }
 0x421   :  { %485 = vmatmul.msk.f32.vlgmr.msrb.gmra.mxu1 %vm82_vm1, %v356_v48 }
 0x428   :  { %v359_v49 = vpop.f32.mrf.mxu3 }
 0x429   :  { %486 = vmatmul.msk.f32.gmra.mxu1 %vm82_vm1, %v359_v49 }
 0x49e   :  { %v389_v13 = vpop.f32.mrf.mxu1 }
 0x49f   :  { %397 = vrot.lane.b32.xlu2 %v389_v13, %s597_s28 }
 0x4a6   :  { %v392_v50 = vpop.f32.mrf.mxu1 }
 0x4a7   :  { %427 = vrot.lane.b32.xlu2 %v359_v49, %s598_s29  ;;  %399 = vrot.lane.b32.xlu0 %v392_v50, %s597_s28 }
 0x4af   :  { %425 = vrot.lane.b32.xlu0 %v356_v48, %s598_s29 }
 0x4f9   :  { %v398_v53 = vpop.permute.xlu2 %397 }
 0x4fa   :  { %v403_v55 = vadd.f32 %v398_v53, %v706_v51 }
 0x4fc   :  { %v411_v56 = vadd.f32 %v409_v54, %v403_v55 }
 0x4fe   :  { %v413_v57 = vmax.f32 %v411_v56, 0.0 }
 0x500   :  { %417 = vrot.lane.b32.xlu1 %v413_v57, %s597_s28 }
 0x501   :  { %v428_v58 = vpop.permute.xlu2 %427 }
 0x502   :  { %v432_v59 = vadd.f32 %v428_v58, %v649_v8 }
 0x508   :  { %437 = vrot.lane.b32.xlu1 %v432_v59, %s593_s27 }
 0x519   :  { %v400_v60 = vpop.permute.xlu0 %399 }
 0x51a   :  { %v404_v62 = vadd.f32 %v400_v60, %v708_v52 }
 0x51c   :  { %v412_v63 = vadd.f32 %v409_v54, %v404_v62 }
 0x51e   :  { %v414_v0 = vmax.f32 %v412_v63, 0.0 }
 0x520   :  { %419 = vrot.lane.b32.xlu0 %v414_v0, %s597_s28 }
 0x521   :  { %v426_v1 = vpop.permute.xlu0 %425 }
 0x522   :  { %v431_v2 = vadd.f32 %v426_v1, %v641_v6 }
 0x524   :  { %435 = vrot.lane.b32.xlu2 %v431_v2, %s593_s27  ;;  %s600_s27 = smov 128  }
 0x572   :  { %v418_v51 = vpop.permute.xlu1 %417 }
 0x573   :  { %v423_v3 = vadd.f32 %v418_v51, %v60_v19 }
 0x57a   :  { %v438_v7 = vpop.permute.xlu1 %437 }
 0x57e   :  { %v436_v4 = vpop.permute.xlu2 %435 }
 0x57f   :  { %v441_v8 = vsel %vm82_vm1, %v423_v3, %v436_v4 }
 0x580   :  { %v443_v5 = vsel %vm328_vm4, %v441_v8, %v356_v48 }
 0x581   :  { %445 = vst [vmem:[#allocation3] sm:$0xff] %v443_v5 }
 0x592   :  { %v420_v52 = vpop.permute.xlu0 %419 }
 0x593   :  { %v424_v6 = vadd.f32 %v420_v52, %v61_v22 }
 0x595   :  { %v442_v18 = vsel %vm82_vm1, %v424_v6, %v438_v7 }
 0x596   :  { %v444_v19 = vsel %vm328_vm4, %v442_v18, %v359_v49 }
 0x597   :  { %446 = vst [vmem:[#allocation3 + $0x8] sm:$0xff] %v444_v19 }
 0x598   :  { %459 = dma.vmem_to_hbm [thread:$0]  %s452_s2, 256, %s454_s5, [#allocation4], %s600_s27, %s600_s27, %s601_s6  }
 0x599   :  { %590 = dma.done.wait [#allocation4], 256  }
 0x59a   :  { %591 = vsyncadd [#allocation4], 4294967040 }
 0x59b   :  { %464 = vsyncpa [#allocation4], 1 }

</bundles_post_ra>
